<compile_context>
chip_gen: v5e
topology: v5e:2x2
jax: 0.10.0
libtpu: 0.0.40
codegen_flags: <defaults>
</compile_context>

<pallas_src>
import functools

import jax
import jax.numpy as jnp
from jax.experimental import pallas as pl
from jax.experimental.pallas import tpu as pltpu


def _round_up(x, m):
    return ((x + m - 1) // m) * m


# -----------------------------------------------------------------------------
# Kernels.  All statistics in f32; TWO-PASS mean/var (review correctness note:
# avoids the catastrophic cancellation of the one-pass E[x^2]-E[x]^2 form) and
# an exact divide for 1/(std+eps) (review: approx reciprocal bought nothing).
# The kernel is HBM-bound, so none of this extra compute is on the critical
# path; the epilogue stays f32 because the two-pass form needs the centered f32
# tensor anyway.
# -----------------------------------------------------------------------------
def _layernorm_wide_kernel(x_ref, a_ref, b_ref, o_ref, *, eps, features):
    """x_ref: (tile_rows, features); one normalized row per tensor row."""
    x = x_ref[...].astype(jnp.float32)
    mean = jnp.sum(x, axis=-1, keepdims=True) * (1.0 / jnp.float32(features))
    d = x - mean
    # torch.Tensor.std() is UNBIASED (ddof=1); guard features == 1 (torch would
    # give nan/inf, we avoid a hard divide-by-zero).
    ddof = jnp.float32(max(features - 1, 1))
    var = jnp.sum(d * d, axis=-1, keepdims=True) / ddof
    inv = 1.0 / (jnp.sqrt(var) + jnp.float32(eps))   # eps added to std, per module
    a = a_ref[...].astype(jnp.float32)
    b = b_ref[...].astype(jnp.float32)
    o_ref[...] = (d * inv * a + b).astype(o_ref.dtype)


def _layernorm_packed_kernel(x_ref, a_ref, b_ref, sel_ref, o_ref, *,
                             eps, features):
    """Lane-packed path: each 128-lane row holds G = 128 // features rows.

    sel_ref is a (128, 128) block-diagonal ones matrix; `x @ sel` puts, in every
    lane, the sum over that lane's own `features`-wide segment — reduction and
    broadcast-back in one 128x128 MXU contraction, keeping the natural lane
    layout throughout (everything is row-local, so ragged-edge garbage rows
    never contaminate valid rows).
    """
    x = x_ref[...].astype(jnp.float32)
    sel = sel_ref[...]                                   # (128, 128) f32 0/1
    inv_n = 1.0 / jnp.float32(features)
    mean = jnp.dot(x, sel, preferred_element_type=jnp.float32) * inv_n
    d = x - mean
    ddof = jnp.float32(max(features - 1, 1))
    var = jnp.dot(d * d, sel, preferred_element_type=jnp.float32) / ddof
    inv = 1.0 / (jnp.sqrt(var) + jnp.float32(eps))
    a = a_ref[...].astype(jnp.float32)
    b = b_ref[...].astype(jnp.float32)
    o_ref[...] = (d * inv * a + b).astype(o_ref.dtype)


# -----------------------------------------------------------------------------
# Tiling policy (review items #2-#6): no hard row cap, chip-gated block sizes
# and VMEM ceilings, and the "extra grid steps" heuristic only fires when each
# block stays >= ~1 MiB.
# -----------------------------------------------------------------------------
def _vmem_capacity_bytes():
    """Physical VMEM of the current chip; conservative (v7x) fallback."""
    try:
        cap = int(pltpu.get_tpu_info().vmem_capacity_bytes)
        if cap > 0:
            return cap
    except Exception:
        pass
    return 64 << 20


def _pick_tiling(rows, width, dtype):
    """Row-tile + scoped-VMEM limit for streaming a (rows, width) array."""
    itemsize = jnp.dtype(dtype).itemsize
    sublane = max(8, 32 // max(itemsize, 1))        # 8 f32 / 16 bf16 / 32 int8

    vmem_cap = _vmem_capacity_bytes()
    if vmem_cap >= (96 << 20):
        # v5e / v6e: 128 MiB physical VMEM -> big blocks, generous scoped limit.
        target_block_bytes = 8 << 20
        vmem_ceiling = 96 << 20
    else:
        # v7x: 64 MiB per TensorCore; ~4 MiB blocks keep the ~0.35 us per-step
        # overhead <10% at ~3.2 TB/s while leaving double-buffer headroom.
        target_block_bytes = 4 << 20
        vmem_ceiling = 48 << 20

    row_bytes = max(width * itemsize, 1)
    t = max(sublane, target_block_bytes // row_bytes)    # no hard row cap

    # Keep a handful of grid steps (megacore sharding / pipeline depth), but
    # never shrink a block below ~1 MiB just to manufacture steps.
    min_par_rows = max(sublane, (1 << 20) // row_bytes)
    if rows >= 4 * min_par_rows:
        t = min(t, max(min_par_rows, _round_up(pl.cdiv(rows, 4), sublane)))

    t = min(t, _round_up(rows, sublane))
    t = int(_round_up(t, sublane))

    def vmem_need(tr):
        blk = tr * width * itemsize
        # double-buffered in + out blocks, ~4 full-tile f32 intermediates
        # (f32 x, centered x, squares, result), plus params/bookkeeping slack.
        return 4 * blk + 4 * tr * width * 4 + (2 << 20)

    while t > sublane and vmem_need(t) > vmem_ceiling:
        t = int(_round_up(max(t // 2, sublane), sublane))
    # TODO(synk): if even a single sublane of rows at this width blows the VMEM
    # budget (huge hidden sizes on v7x), split the feature axis into a second
    # "arbitrary" grid dim with partial-sum accumulators in VMEM scratch.

    vmem_limit = int(min(max(vmem_need(t), 32 << 20), vmem_ceiling))
    return t, vmem_limit


# -----------------------------------------------------------------------------
# Wrapper
# -----------------------------------------------------------------------------
def layer_norm(x, a_2, b_2, *, eps=1e-6):
    """LayerNorm over the last axis of x, matching the PyTorch module forward."""
    orig_shape = x.shape
    features = orig_shape[-1]
    rows = 1
    for s in orig_shape[:-1]:
        rows *= s
    x2 = x.reshape(rows, features)
    a2 = a_2.reshape(1, features)
    b2 = b_2.reshape(1, features)

    # Lane-pack small feature dims so the kernel's loads/stores are full
    # 128-lane accesses instead of masked partial vst (biggest single lever for
    # small hidden sizes).  Feature dims that don't divide 128 fall back to the
    # unpacked path (partially masked stores, still correct).
    packed = features < 128 and 128 % features == 0
    if packed:
        G = 128 // features
        # Pad so (a) rows fold evenly into packed rows and (b) the tiny-demo
        # case still presents >= 8 packed rows (one full sublane tile).  Padded
        # zero rows normalize to `beta` and are sliced off below; all math is
        # row-local so they never mix with real rows.
        rows_pad = max(_round_up(max(rows, 1), G), G * 8)
        if rows_pad != rows:
            x2 = jnp.pad(x2, ((0, rows_pad - rows), (0, 0)))
        xk = x2.reshape(rows_pad // G, 128)                 # contiguous reshape
        ak = jnp.tile(a2, (1, G))
        bk = jnp.tile(b2, (1, G))
        seg = jnp.arange(128, dtype=jnp.int32) // features
        sel = (seg[:, None] == seg[None, :]).astype(jnp.float32)   # (128, 128)
        krows, width = rows_pad // G, 128
    else:
        xk, ak, bk = x2, a2, b2
        krows, width = rows, features

    tile_rows, vmem_limit = _pick_tiling(krows, width, x.dtype)
    grid = (pl.cdiv(krows, tile_rows),)

    row_spec = pl.BlockSpec((tile_rows, width), lambda i: (i, 0))
    const_spec = pl.BlockSpec((1, width), lambda i: (0, 0))

    if packed:
        kernel = functools.partial(_layernorm_packed_kernel, eps=eps,
                                   features=features)
        in_specs = [row_spec, const_spec, const_spec,
                    pl.BlockSpec((128, 128), lambda i: (0, 0))]
        operands = (xk, ak, bk, sel)
    else:
        kernel = functools.partial(_layernorm_wide_kernel, eps=eps,
                                   features=features)
        in_specs = [row_spec, const_spec, const_spec]
        operands = (xk, ak, bk)

    out = pl.pallas_call(
        kernel,
        out_shape=jax.ShapeDtypeStruct((krows, width), x.dtype),
        grid=grid,
        in_specs=in_specs,
        out_specs=row_spec,
        compiler_params=pltpu.CompilerParams(
            dimension_semantics=("parallel",),
            vmem_limit_bytes=vmem_limit),
    )(*operands)

    if packed:
        out = out.reshape(rows_pad, features)[:rows]
    return out.reshape(orig_shape)


# -----------------------------------------------------------------------------
# Self-check
# -----------------------------------------------------------------------------
def _reference(x, a_2, b_2, eps):
    n = x.shape[-1]
    mean = jnp.mean(x, axis=-1, keepdims=True)
    std = jnp.sqrt(jnp.sum((x - mean) ** 2, axis=-1, keepdims=True)
                   / max(n - 1, 1))
    return a_2 * (x - mean) / (std + eps) + b_2


if __name__ == "__main__":
    key = jax.random.PRNGKey(0)
    eps = 1e-6

    # Demo shape implied by the module usage: (batch=2, seq=8, hidden=32).
    batch, seq, hidden = 2, 8, 32
    k1, k2 = jax.random.split(key)
    x = jax.random.normal(k1, (batch, seq, hidden), dtype=jnp.float32)
    a_2 = jnp.ones((hidden,), dtype=jnp.float32)    # nn.Parameter(torch.ones)
    b_2 = jnp.zeros((hidden,), dtype=jnp.float32)   # nn.Parameter(torch.zeros)

    y = jax.block_until_ready(layer_norm(x, a_2, b_2, eps=eps))
    ref = _reference(x, a_2, b_2, eps)
    # Packed path: segment sums go through the MXU; tolerance covers worst-case
    # reduced-precision MXU passes for that contraction (f32 path gives ~1e-6).
    assert jnp.allclose(y, ref, atol=2e-3, rtol=2e-3), "packed-path mismatch"

    # Also exercise the wide (features >= 128) path once.
    hidden_w = 256
    xw = jax.random.normal(k2, (batch, seq, hidden_w), dtype=jnp.float32)
    aw = jnp.ones((hidden_w,), dtype=jnp.float32)
    bw = jnp.zeros((hidden_w,), dtype=jnp.float32)
    yw = jax.block_until_ready(layer_norm(xw, aw, bw, eps=eps))
    refw = _reference(xw, aw, bw, eps)
    assert jnp.allclose(yw, refw, atol=1e-4, rtol=1e-4), "wide-path mismatch"

    print("KERNEL_OK")
</pallas_src>

<mosaic_0001>
module attributes {stable_mosaic.version = 11 : i64} {
  func.func @_layernorm_packed_kernel(%arg0: i32, %arg1: memref<8x128xf32, #tpu.memory_space<vmem>>, %arg2: memref<1x128xf32, #tpu.memory_space<vmem>>, %arg3: memref<1x128xf32, #tpu.memory_space<vmem>>, %arg4: memref<128x128xf32, #tpu.memory_space<vmem>>, %arg5: memref<8x128xf32, #tpu.memory_space<vmem>>) attributes {dimension_semantics = [#tpu.dimension_semantics<parallel>], iteration_bounds = array<i64: 1>, scalar_prefetch = 0 : i64, scratch_operands = 0 : i64, tpu.core_type = #tpu.core_type<tc>, window_params = [{transform_indices = @transform_0, window_bounds = array<i64: 8, 128>}, {pipeline_mode = #tpu.pipeline_mode<synchronous>, transform_indices = @transform_1, window_bounds = array<i64: 1, 128>}, {pipeline_mode = #tpu.pipeline_mode<synchronous>, transform_indices = @transform_2, window_bounds = array<i64: 1, 128>}, {pipeline_mode = #tpu.pipeline_mode<synchronous>, transform_indices = @transform_3, window_bounds = array<i64: 128, 128>}, {transform_indices = @transform_4, window_bounds = array<i64: 8, 128>}]} {
    %c0 = arith.constant 0 : index
    %c0_0 = arith.constant 0 : index
    %0 = vector.load %arg1[%c0, %c0_0] : memref<8x128xf32, #tpu.memory_space<vmem>>, vector<8x128xf32>
    %c0_1 = arith.constant 0 : index
    %c0_2 = arith.constant 0 : index
    %1 = vector.load %arg4[%c0_1, %c0_2] : memref<128x128xf32, #tpu.memory_space<vmem>>, vector<128x128xf32>
    %cst = arith.constant 1.000000e+00 : f32
    %cst_3 = arith.constant 3.200000e+01 : f32
    %2 = arith.divf %cst, %cst_3 : f32
    %cst_4 = arith.constant dense<0.000000e+00> : vector<8x128xf32>
    %3 = tpu.matmul %0, %1, %cst_4 {dimension_numbers = #tpu.dot_dimension_numbers<[1], [0], [0], [1], [0, 0, 1, 1], [], []>} : vector<8x128xf32>, vector<128x128xf32>, vector<8x128xf32> -> vector<8x128xf32>
    %4 = vector.broadcast %2 : f32 to vector<8x128xf32>
    %5 = arith.mulf %3, %4 : vector<8x128xf32>
    %6 = arith.subf %0, %5 : vector<8x128xf32>
    %7 = arith.mulf %6, %6 : vector<8x128xf32>
    %cst_5 = arith.constant dense<0.000000e+00> : vector<8x128xf32>
    %8 = tpu.matmul %7, %1, %cst_5 {dimension_numbers = #tpu.dot_dimension_numbers<[1], [0], [0], [1], [0, 0, 1, 1], [], []>} : vector<8x128xf32>, vector<128x128xf32>, vector<8x128xf32> -> vector<8x128xf32>
    %cst_6 = arith.constant 3.100000e+01 : f32
    %9 = vector.broadcast %cst_6 : f32 to vector<8x128xf32>
    %10 = arith.divf %8, %9 : vector<8x128xf32>
    %11 = math.sqrt %10 : vector<8x128xf32>
    %cst_7 = arith.constant 9.99999997E-7 : f32
    %12 = vector.broadcast %cst_7 : f32 to vector<8x128xf32>
    %13 = arith.addf %11, %12 : vector<8x128xf32>
    %cst_8 = arith.constant 1.000000e+00 : f32
    %14 = vector.broadcast %cst_8 : f32 to vector<8x128xf32>
    %15 = arith.divf %14, %13 : vector<8x128xf32>
    %c0_9 = arith.constant 0 : index
    %c0_10 = arith.constant 0 : index
    %16 = vector.load %arg2[%c0_9, %c0_10] : memref<1x128xf32, #tpu.memory_space<vmem>>, vector<1x128xf32>
    %c0_11 = arith.constant 0 : index
    %c0_12 = arith.constant 0 : index
    %17 = vector.load %arg3[%c0_11, %c0_12] : memref<1x128xf32, #tpu.memory_space<vmem>>, vector<1x128xf32>
    %18 = arith.mulf %6, %15 : vector<8x128xf32>
    %19 = vector.broadcast %16 : vector<1x128xf32> to vector<8x128xf32>
    %20 = arith.mulf %18, %19 : vector<8x128xf32>
    %21 = vector.broadcast %17 : vector<1x128xf32> to vector<8x128xf32>
    %22 = arith.addf %20, %21 : vector<8x128xf32>
    %c0_13 = arith.constant 0 : index
    %c0_14 = arith.constant 0 : index
    %23 = vector.load %arg5[%c0_13, %c0_14] : memref<8x128xf32, #tpu.memory_space<vmem>>, vector<8x128xf32>
    tpu.vector_store %arg5[%c0_13, %c0_14], %22 {strides = array<i32>} : memref<8x128xf32, #tpu.memory_space<vmem>>, vector<8x128xf32>,
    return
  }
  func.func @transform_0(%arg0: i32) -> (i32, i32) {
    %c0_i32 = arith.constant 0 : i32
    %c0_i32_0 = arith.constant 0 : i32
    return %arg0, %c0_i32 : i32, i32
  }
  func.func @transform_1(%arg0: i32) -> (i32, i32) {
    %c0_i32 = arith.constant 0 : i32
    %c0_i32_0 = arith.constant 0 : i32
    %c0_i32_1 = arith.constant 0 : i32
    return %c0_i32, %c0_i32_0 : i32, i32
  }
  func.func @transform_2(%arg0: i32) -> (i32, i32) {
    %c0_i32 = arith.constant 0 : i32
    %c0_i32_0 = arith.constant 0 : i32
    %c0_i32_1 = arith.constant 0 : i32
    return %c0_i32, %c0_i32_0 : i32, i32
  }
  func.func @transform_3(%arg0: i32) -> (i32, i32) {
    %c0_i32 = arith.constant 0 : i32
    %c0_i32_0 = arith.constant 0 : i32
    %c0_i32_1 = arith.constant 0 : i32
    return %c0_i32, %c0_i32_0 : i32, i32
  }
  func.func @transform_4(%arg0: i32) -> (i32, i32) {
    %c0_i32 = arith.constant 0 : i32
    %c0_i32_0 = arith.constant 0 : i32
    return %arg0, %c0_i32 : i32, i32
  }
}

</mosaic_0001>

<bundles_post_ra>
// kernel: tpu_custom_call.1
= control target key start
LH: loop header
LB: loop body
LE: loop exit
PB: predicated region body
PF: predicated region fallthrough
CT: control target
= control target key end

     0   :  { %9 = vsyncpa [#allocation3], 0  ;;  %s351_s0 = inlined_call_operand.hbm [shape: f32[8,128], index: 0, kind: input, shape index: {}]   ;;  %s352_s1 = inlined_call_operand.hbm [shape: f32[1,128], index: 1, kind: input, shape index: {}]   ;;  %s353_s2 = inlined_call_operand.vmem [shape: f32[1,128], index: 2, kind: input, shape index: {}]   ;;  %s354_s3 = inlined_call_operand.hbm [shape: f32[128,128], index: 3, kind: input, shape index: {}]   ;;  %s355_s4 = inlined_call_operand.hbm [shape: f32[8,128], index: 4, kind: output, shape index: {}]  }
   0x1   :  { %10 = vsyncpa [#allocation6], 0  ;;  %s28_s17 = sshll.u32 %s352_s1, 4  ;;  %s29_s17 = int_to_ptr.hbm [resolvable:$true] %s28_s17 }
   0x2   :  { %11 = vsyncpa [#allocation4], 0  ;;  %s304_s18 = smov [#allocation5]   ;;  %s17_s22 = sshll.u32 %s351_s0, 4  ;;  %s18_s22 = int_to_ptr.hbm [resolvable:$true] %s17_s22 }
   0x3   :  { %s30_s19 = sshll.u32 %s304_s18, 4  ;;  %s305_s23 = smov [#allocation2]   ;;  %s31_s19 = int_to_ptr.vmem [resolvable:$true] %s30_s19 }
   0x4   :  { %33 = dma.hbm_to_vmem [thread:$0]  %s29_s17, 16, %s31_s19, [#allocation6]  }
   0x5   :  { %s19_s24 = sshll.u32 %s305_s23, 4  ;;  %s40_s27 = sshll.u32 %s354_s3, 4  ;;  %s20_s24 = int_to_ptr.vmem [resolvable:$true] %s19_s24  ;;  %s41_s27 = int_to_ptr.hbm [resolvable:$true] %s40_s27 }
   0x6   :  { %22 = dma.hbm_to_vmem [thread:$0]  %s18_s22, 128, %s20_s24, [#allocation3]  }
   0x7   :  { %s306_s1 = smov [#allocation7]   ;;  %s307_s29 = smov 128  }
   0x8   :  { %s42_s28 = sshll.u32 %s306_s1, 4  ;;  %s308_s30 = smov 8   ;;  %s43_s28 = int_to_ptr.vmem [resolvable:$true] %s42_s28 }
   0x9   :  { %48 = dma.hbm_to_vmem [thread:$0]  %s41_s27, 2048, %s43_s28, [#allocation6], %s307_s29, %s307_s29, %s308_s30  }
   0xa   :  { %298 = dma.done.wait [#allocation3], 128  }
   0xb   :  { %299 = vsyncadd [#allocation3], 4294967168 }
   0xc   :  { %300 = dma.done.wait [#allocation6], 2064  }
   0xd   :  { %301 = vsyncadd [#allocation6], 4294965232  ;;  %v77_v0 = vld [vmem:[#allocation7 + $0x78] sm:$0xff]  ;;  %v76_v1 = vld [vmem:[#allocation7 + $0x70] sm:$0xff]  ;;  %v309_v21 = vmov 31.0   ;;  %s310_s5 = smov [#allocation8]  }
   0xe   :  { %78 = vmatpush.msra.mxu0 %v77_v0  ;;  %101 = vmatpush.msra.mxu1 %v77_v0  ;;  %v75_v2 = vld [vmem:[#allocation7 + $0x68] sm:$0xff]  ;;  %v74_v3 = vld [vmem:[#allocation7 + $0x60] sm:$0xff]  ;;  %v73_v4 = vld [vmem:[#allocation7 + $0x58] sm:$0xff]  ;;  %196 = vrcp.f32 %v309_v21  ;;  %s174_s6 = sshll.u32 %s310_s5, 4  ;;  %s176_s9 = sshll.u32 %s355_s4, 4  ;;  %s175_s6 = int_to_ptr.vmem [resolvable:$true] %s174_s6  ;;  %s177_s9 = int_to_ptr.hbm [resolvable:$true] %s176_s9 }
   0xf   :  { %v72_v5 = vld [vmem:[#allocation7 + $0x50] sm:$0xff]  ;;  %v71_v6 = vld [vmem:[#allocation7 + $0x48] sm:$0xff]  ;;  %v70_v7 = vld [vmem:[#allocation7 + $0x40] sm:$0xff] }
  0x10   :  { %79 = vmatpush.msra.mxu0 %v76_v1  ;;  %102 = vmatpush.msra.mxu1 %v76_v1  ;;  %v69_v8 = vld [vmem:[#allocation7 + $0x38] sm:$0xff]  ;;  %v68_v9 = vld [vmem:[#allocation7 + $0x30] sm:$0xff]  ;;  %v67_v10 = vld [vmem:[#allocation7 + $0x28] sm:$0xff] }
  0x11   :  { %v66_v11 = vld [vmem:[#allocation7 + $0x20] sm:$0xff]  ;;  %v65_v12 = vld [vmem:[#allocation7 + $0x18] sm:$0xff]  ;;  %v64_v13 = vld [vmem:[#allocation7 + $0x10] sm:$0xff] }
  0x12   :  { %80 = vmatpush.msra.mxu0 %v75_v2  ;;  %103 = vmatpush.msra.mxu1 %v75_v2  ;;  %v63_v14 = vld [vmem:[#allocation7 + $0x8] sm:$0xff]  ;;  %v62_v15 = vld [vmem:[#allocation7] sm:$0xff]  ;;  %v61_v16 = vld [vmem:[#allocation2] sm:$0xff] }
  0x13   :  { %v194_v50 = vld [vmem:[#allocation5] ss:$0 sm:$0xff]  ;;  %v195_v53 = vld [vmem:[%s353_s2] ss:$0 sm:$0xff] }
  0x14   :  { %81 = vmatpush.msra.mxu0 %v74_v3  ;;  %104 = vmatpush.msra.mxu1 %v74_v3  ;;  %v197_v22 = vpop.eup %196 }
  0x15   :  { %v122_v23 = vmul.f32 31.0, %v197_v22  ;;  %vm126_vm0 = vweird.f32 %v197_v22 }
  0x16   :  { %82 = vmatpush.msra.mxu0 %v73_v4  ;;  %105 = vmatpush.msra.mxu1 %v73_v4 }
  0x17   :  { %v123_v24 = vsub.f32 1.0, %v122_v23 }
  0x18   :  { %83 = vmatpush.msra.mxu0 %v72_v5  ;;  %106 = vmatpush.msra.mxu1 %v72_v5 }
  0x19   :  { %v124_v25 = vmul.f32 %v197_v22, %v123_v24 }
  0x1a   :  { %84 = vmatpush.msra.mxu0 %v71_v6  ;;  %107 = vmatpush.msra.mxu1 %v71_v6 }
  0x1b   :  { %v125_v26 = vadd.f32 %v197_v22, %v124_v25 }
  0x1c   :  { %85 = vmatpush.msra.mxu0 %v70_v7  ;;  %108 = vmatpush.msra.mxu1 %v70_v7 }
  0x1d   :  { %v127_v27 = vsel %vm126_vm0, %v197_v22, %v125_v26 }
  0x1e   :  { %86 = vmatpush.msra.mxu0 %v69_v8  ;;  %109 = vmatpush.msra.mxu1 %v69_v8 }
  0x20   :  { %87 = vmatpush.msra.mxu0 %v68_v9  ;;  %110 = vmatpush.msra.mxu1 %v68_v9 }
  0x22   :  { %88 = vmatpush.msra.mxu0 %v67_v10  ;;  %111 = vmatpush.msra.mxu1 %v67_v10 }
  0x24   :  { %89 = vmatpush.msra.mxu0 %v66_v11  ;;  %112 = vmatpush.msra.mxu1 %v66_v11 }
  0x26   :  { %90 = vmatpush.msra.mxu0 %v65_v12  ;;  %113 = vmatpush.msra.mxu1 %v65_v12 }
  0x28   :  { %91 = vmatpush.msra.mxu0 %v64_v13  ;;  %114 = vmatpush.msra.mxu1 %v64_v13 }
  0x2a   :  { %92 = vmatpush.msra.mxu0 %v63_v14  ;;  %115 = vmatpush.msra.mxu1 %v63_v14 }
  0x2c   :  { %93 = vmatpush.msra.mxu0 %v62_v15  ;;  %116 = vmatpush.msra.mxu1 %v62_v15 }
  0x2d   :  { %94 = vmatmul.f32.vlgmr.msra.gmra.mxu0 %v61_v16 }
  0xaa   :  { %v95_v17 = vpop.f32.mrf.mxu0 }
  0xab   :  { %v98_v18 = vmul.f32 0.03125, %v95_v17 }
  0xad   :  { %v99_v19 = vsub.f32 %v61_v16, %v98_v18 }
  0xaf   :  { %v100_v20 = vmul.f32 %v99_v19, %v99_v19 }
  0xb1   :  { %117 = vmatmul.f32.vlgmr.msra.gmra.mxu1 %v100_v20 }
 0x12e   :  { %v118_v28 = vpop.f32.mrf.mxu1 }
 0x12f   :  { %v128_v29 = vmul.f32 %v127_v27, %v118_v28 }
 0x131   :  { %198 = vrsqrt.f32 %v128_v29  ;;  %vm136_vm1 = vcmp.eq.f32.partialorder %v128_v29, inf  ;;  %v139_v37 = vand.u32 2147483648, %v128_v29  ;;  %vm138_vm2 = vcmp.eq.f32.partialorder %v128_v29, 0.0 }
 0x137   :  { %v199_v30 = vpop.eup %198 }
 0x138   :  { %v130_v31 = vmul.f32 %v199_v30, %v128_v29 }
 0x13a   :  { %v131_v32 = vmul.f32 %v199_v30, %v130_v31 }
 0x13c   :  { %v132_v33 = vmul.f32 0.5, %v131_v32 }
 0x13e   :  { %v133_v34 = vsub.f32 1.5, %v132_v33 }
 0x140   :  { %v134_v35 = vmul.f32 %v199_v30, %v133_v34 }
 0x142   :  { %v135_v36 = vmul.f32 %v134_v35, %v128_v29 }
 0x144   :  { %v137_v38 = vsel %vm136_vm1, %v128_v29, %v135_v36 }
 0x145   :  { %v140_v39 = vsel %vm138_vm2, %v139_v37, %v137_v38 }
 0x146   :  { %v141_v40 = vadd.f32 1e-06, %v140_v39 }
 0x148   :  { %200 = vrcp.f32 %v141_v40  ;;  %v153_v44 = vand.u32 2147483648, %v141_v40  ;;  %v151_v46 = vand.u32 2147483647, %v141_v40  ;;  %vm147_vm4 = vweird.f32 %v141_v40 }
 0x14a   :  { %v154_v48 = vor.u32 1.1754944e-38, %v153_v44  ;;  %vm152_vm6 = vcmp.eq.f32.partialorder %v151_v46, 8.507059e+37 }
 0x14e   :  { %v201_v41 = vpop.eup %200 }
 0x14f   :  { %v143_v42 = vmul.f32 %v201_v41, %v141_v40  ;;  %vm148_vm3 = vweird.f32 %v201_v41 }
 0x150   :  { %vm149_vm5 = vmor %vm147_vm4, %vm148_vm3 }
 0x151   :  { %v144_v43 = vsub.f32 1.0, %v143_v42 }
 0x153   :  { %v145_v45 = vmul.f32 %v201_v41, %v144_v43 }
 0x155   :  { %v146_v47 = vadd.f32 %v201_v41, %v145_v45 }
 0x157   :  { %v150_v49 = vsel %vm149_vm5, %v201_v41, %v146_v47 }
 0x158   :  { %v155_v51 = vsel %vm152_vm6, %v154_v48, %v150_v49 }
 0x159   :  { %v159_v52 = vmul.f32 %v155_v51, %v99_v19 }
 0x15b   :  { %v163_v54 = vmul.f32 %v194_v50, %v159_v52 }
 0x15d   :  { %v167_v55 = vadd.f32 %v195_v53, %v163_v54 }
 0x15f   :  { %168 = vst [vmem:[#allocation8] sm:$0xff] %v167_v55 }
 0x160   :  { %179 = dma.vmem_to_hbm [thread:$0]  %s175_s6, 128, %s177_s9, [#allocation4]  }
 0x161   :  { %302 = dma.done.wait [#allocation4], 128  }
 0x162   :  { %303 = vsyncadd [#allocation4], 4294967168 }
 0x163   :  { %184 = vsyncpa [#allocation3], 1 }
 0x164   :  { %185 = vsyncpa [#allocation6], 1 }
 0x165   :  { %186 = vsyncpa [#allocation4], 1 }

</bundles_post_ra>
